<compile_context>
chip_gen: v6e
topology: v6e:2x2x1
jax: 0.10.0
libtpu: 0.0.40
codegen_flags: <defaults>
</compile_context>

<pallas_src>
import jax
import jax.numpy as jnp
from jax.experimental import pallas as pl
from jax.experimental.pallas import tpu as pltpu


def _round_up(x, m):
    return ((x + m - 1) // m) * m


def perceptron_kernel(x_ref, wt_ref, b_ref, o_ref, acc_ref):
    # x_ref:  (TM, TK)   activations
    # wt_ref: (TK, TN)   pre-transposed weights (IN, OUT) -> MXU fed directly
    # b_ref:  (1,  TN)   bias tile for output-column block j
    # o_ref:  (TM, TN)   sigmoid(x @ W^T + b)
    # acc_ref:(TM, TN)   f32 accumulator scratch (resident across the K axis)
    k = pl.program_id(2)

    @pl.when(k == 0)
    def _():
        acc_ref[...] = jnp.zeros_like(acc_ref)

    acc_ref[...] += jnp.dot(x_ref[...], wt_ref[...],
                            preferred_element_type=jnp.float32)

    @pl.when(k == pl.num_programs(2) - 1)
    def _():
        z = acc_ref[...] + b_ref[...]            # bias broadcast (1,TN)->(TM,TN)
        e = jnp.exp(-z)                          # EUP transcendental
        # sigmoid = 1 / (1 + e): reciprocal on the EUP slot, not a VALU divide.
        o_ref[...] = pl.reciprocal(1.0 + e, approx=True)


def perceptron_forward(x, w, b):
    """x: (B, IN) f32, w: (OUT, IN) like nn.Linear.weight, b: (OUT,)."""
    B, IN = x.shape
    OUT = w.shape[0]

    # Pad to lane/sublane-friendly sizes (zero padding is exact for matmul+bias;
    # extra rows/cols are sliced off below).
    M = _round_up(B, 8)
    K = _round_up(IN, 128)
    N = _round_up(OUT, 128)

    x_p = jnp.zeros((M, K), jnp.float32).at[:B, :IN].set(x.astype(jnp.float32))
    wt_p = jnp.zeros((K, N), jnp.float32).at[:IN, :OUT].set(
        w.astype(jnp.float32).T)                      # pre-transposed: (IN, OUT)
    b_p = jnp.zeros((1, N), jnp.float32).at[0, :OUT].set(b.astype(jnp.float32))

    # Tile sizes: full-extent at toy sizes, 128/256-aligned tiles when scaled up.
    # TODO(synk): for v6e/v7x at real sizes, cast x/W to bf16 (keep f32 accum) and
    # budget tiles against the per-generation VMEM limit (64 MiB on v7x).
    TM = 128 if M % 128 == 0 else M
    TN = 256 if N % 256 == 0 else (128 if N % 128 == 0 else N)
    TK = 256 if K % 256 == 0 else (128 if K % 128 == 0 else K)

    grid = (M // TM, N // TN, K // TK)

    out = pl.pallas_call(
        perceptron_kernel,
        out_shape=jax.ShapeDtypeStruct((M, N), jnp.float32),
        grid_spec=pltpu.PrefetchScalarGridSpec(
            num_scalar_prefetch=0,
            grid=grid,
            in_specs=[
                pl.BlockSpec((TM, TK), lambda i, j, k: (i, k)),   # x
                pl.BlockSpec((TK, TN), lambda i, j, k: (k, j)),   # W^T
                pl.BlockSpec((1, TN), lambda i, j, k: (0, j)),    # bias
            ],
            out_specs=pl.BlockSpec((TM, TN), lambda i, j, k: (i, j)),
            scratch_shapes=[pltpu.VMEM((TM, TN), jnp.float32)],
        ),
        compiler_params=pltpu.CompilerParams(
            dimension_semantics=("parallel", "parallel", "arbitrary")),
    )(x_p, wt_p, b_p)

    return out[:B, :OUT]


if __name__ == "__main__":
    # Module implies: Perceptron(input_size=2, output_size=1)  (see get_params()).
    batch, input_size, output_size = 8, 2, 1

    key = jax.random.PRNGKey(0)
    kx, kw, kb = jax.random.split(key, 3)

    # Deterministic PyTorch-style init: U(-1/sqrt(in), 1/sqrt(in)).
    bound = 1.0 / (input_size ** 0.5)
    x = jax.random.normal(kx, (batch, input_size), dtype=jnp.float32)
    w = jax.random.uniform(kw, (output_size, input_size), dtype=jnp.float32,
                           minval=-bound, maxval=bound)
    b = jax.random.uniform(kb, (output_size,), dtype=jnp.float32,
                           minval=-bound, maxval=bound)

    out = perceptron_forward(x, w, b)
    out = jax.block_until_ready(out)

    # Cross-check against plain JAX reference (approx reciprocal -> loose tol).
    ref = jax.nn.sigmoid(x @ w.T + b[None, :])
    assert out.shape == (batch, output_size)
    assert jnp.allclose(out, ref, atol=2e-3, rtol=2e-3), (out, ref)

    print("KERNEL_OK")
</pallas_src>

<mosaic_0001>
module attributes {stable_mosaic.version = 11 : i64} {
  func.func @perceptron_kernel(%arg0: i32, %arg1: i32, %arg2: i32, %arg3: memref<8x128xf32, #tpu.memory_space<vmem>>, %arg4: memref<128x128xf32, #tpu.memory_space<vmem>>, %arg5: memref<1x128xf32, #tpu.memory_space<vmem>>, %arg6: memref<8x128xf32, #tpu.memory_space<vmem>>, %arg7: memref<8x128xf32, #tpu.memory_space<vmem>>) attributes {dimension_semantics = [#tpu.dimension_semantics<parallel>, #tpu.dimension_semantics<parallel>, #tpu.dimension_semantics<arbitrary>], iteration_bounds = array<i64: 1, 1, 1>, scalar_prefetch = 0 : i64, scratch_operands = 1 : i64, tpu.core_type = #tpu.core_type<tc>, window_params = [{transform_indices = @transform_0, window_bounds = array<i64: 8, 128>}, {transform_indices = @transform_1, window_bounds = array<i64: 128, 128>}, {transform_indices = @transform_2, window_bounds = array<i64: 1, 128>}, {transform_indices = @transform_3, window_bounds = array<i64: 8, 128>}]} {
    %c0_i32 = arith.constant 0 : i32
    %0 = arith.cmpi eq, %arg2, %c0_i32 : i32
    %1 = arith.extui %0 : i1 to i32
    %c0_i32_0 = arith.constant 0 : i32
    %2 = arith.cmpi ne, %1, %c0_i32_0 : i32
    scf.if %2 {
      %cst_10 = arith.constant 0.000000e+00 : f32
      %12 = vector.broadcast %cst_10 : f32 to vector<8x128xf32>
      %c0_11 = arith.constant 0 : index
      %c0_12 = arith.constant 0 : index
      %13 = vector.load %arg7[%c0_11, %c0_12] : memref<8x128xf32, #tpu.memory_space<vmem>>, vector<8x128xf32>
      tpu.vector_store %arg7[%c0_11, %c0_12], %12 {strides = array<i32>} : memref<8x128xf32, #tpu.memory_space<vmem>>, vector<8x128xf32>,
    } else {
    }
    %c0 = arith.constant 0 : index
    %c0_1 = arith.constant 0 : index
    %3 = vector.load %arg7[%c0, %c0_1] : memref<8x128xf32, #tpu.memory_space<vmem>>, vector<8x128xf32>
    %c0_2 = arith.constant 0 : index
    %c0_3 = arith.constant 0 : index
    %4 = vector.load %arg3[%c0_2, %c0_3] : memref<8x128xf32, #tpu.memory_space<vmem>>, vector<8x128xf32>
    %c0_4 = arith.constant 0 : index
    %c0_5 = arith.constant 0 : index
    %5 = vector.load %arg4[%c0_4, %c0_5] : memref<128x128xf32, #tpu.memory_space<vmem>>, vector<128x128xf32>
    %cst = arith.constant dense<0.000000e+00> : vector<8x128xf32>
    %6 = tpu.matmul %4, %5, %cst {dimension_numbers = #tpu.dot_dimension_numbers<[1], [0], [0], [1], [0, 0, 1, 1], [], []>} : vector<8x128xf32>, vector<128x128xf32>, vector<8x128xf32> -> vector<8x128xf32>
    %7 = arith.addf %3, %6 : vector<8x128xf32>
    %c0_6 = arith.constant 0 : index
    %c0_7 = arith.constant 0 : index
    %8 = vector.load %arg7[%c0_6, %c0_7] : memref<8x128xf32, #tpu.memory_space<vmem>>, vector<8x128xf32>
    tpu.vector_store %arg7[%c0_6, %c0_7], %7 {strides = array<i32>} : memref<8x128xf32, #tpu.memory_space<vmem>>, vector<8x128xf32>,
    %c0_i32_8 = arith.constant 0 : i32
    %9 = arith.cmpi eq, %arg2, %c0_i32_8 : i32
    %10 = arith.extui %9 : i1 to i32
    %c0_i32_9 = arith.constant 0 : i32
    %11 = arith.cmpi ne, %10, %c0_i32_9 : i32
    scf.if %11 {
      %c0_10 = arith.constant 0 : index
      %c0_11 = arith.constant 0 : index
      %12 = vector.load %arg7[%c0_10, %c0_11] : memref<8x128xf32, #tpu.memory_space<vmem>>, vector<8x128xf32>
      %c0_12 = arith.constant 0 : index
      %c0_13 = arith.constant 0 : index
      %13 = vector.load %arg5[%c0_12, %c0_13] : memref<1x128xf32, #tpu.memory_space<vmem>>, vector<1x128xf32>
      %14 = vector.broadcast %13 : vector<1x128xf32> to vector<8x128xf32>
      %15 = arith.addf %12, %14 : vector<8x128xf32>
      %cst_14 = arith.constant 0.000000e+00 : f32
      %16 = vector.broadcast %cst_14 : f32 to vector<8x128xf32>
      %17 = arith.subf %16, %15 : vector<8x128xf32>
      %18 = math.exp %17 : vector<8x128xf32>
      %cst_15 = arith.constant 1.000000e+00 : f32
      %19 = vector.broadcast %cst_15 : f32 to vector<8x128xf32>
      %20 = arith.addf %19, %18 : vector<8x128xf32>
      %21 = tpu.reciprocal %20 {approx = true} : vector<8x128xf32> -> vector<8x128xf32>
      %c0_16 = arith.constant 0 : index
      %c0_17 = arith.constant 0 : index
      %22 = vector.load %arg6[%c0_16, %c0_17] : memref<8x128xf32, #tpu.memory_space<vmem>>, vector<8x128xf32>
      tpu.vector_store %arg6[%c0_16, %c0_17], %21 {strides = array<i32>} : memref<8x128xf32, #tpu.memory_space<vmem>>, vector<8x128xf32>,
    } else {
    }
    return
  }
  func.func @transform_0(%arg0: i32, %arg1: i32, %arg2: i32) -> (i32, i32) {
    %c0_i32 = arith.constant 0 : i32
    return %arg0, %arg2 : i32, i32
  }
  func.func @transform_1(%arg0: i32, %arg1: i32, %arg2: i32) -> (i32, i32) {
    %c0_i32 = arith.constant 0 : i32
    return %arg2, %arg1 : i32, i32
  }
  func.func @transform_2(%arg0: i32, %arg1: i32, %arg2: i32) -> (i32, i32) {
    %c0_i32 = arith.constant 0 : i32
    %c0_i32_0 = arith.constant 0 : i32
    return %c0_i32, %arg1 : i32, i32
  }
  func.func @transform_3(%arg0: i32, %arg1: i32, %arg2: i32) -> (i32, i32) {
    %c0_i32 = arith.constant 0 : i32
    return %arg0, %arg1 : i32, i32
  }
}

</mosaic_0001>

<bundles_post_ra>
// kernel: tpu_custom_call.1
= control target key start
LH: loop header
LB: loop body
LE: loop exit
PB: predicated region body
PF: predicated region fallthrough
CT: control target
= control target key end

     0   :  { %8 = vsyncpa [#allocation4], 0  ;;  %s339_s0 = inlined_call_operand.hbm [shape: f32[8,128], index: 0, kind: input, shape index: {}]   ;;  %s340_s1 = inlined_call_operand.hbm [shape: f32[128,128], index: 1, kind: input, shape index: {}]   ;;  %s341_s2 = inlined_call_operand.vmem [shape: f32[1,128], index: 2, kind: input, shape index: {}]   ;;  %s342_s3 = inlined_call_operand.hbm [shape: f32[8,128], index: 3, kind: output, shape index: {}]  }
   0x1   :  { %9 = vsyncpa [#allocation7], 0 }
   0x2   :  { %10 = vsyncpa [#allocation5], 0  ;;  %s300_s12 = smov [#allocation3]   ;;  %s301_s14 = smov [#allocation6]  }
   0x3   :  { %s17_s13 = sshll.u32 %s300_s12, 4  ;;  %s26_s15 = sshll.u32 %s301_s14, 4  ;;  %s18_s13 = int_to_ptr.vmem [resolvable:$true] %s17_s13  ;;  %s27_s15 = int_to_ptr.vmem [resolvable:$true] %s26_s15 }
   0x4   :  { %s242_s16 = scalar_lea.vmem %s18_s13, 128  ;;  %p247_p1 = scmp.lt.s32.totalorder %s18_s13, %s18_s13 }
   0x5   :  { %p243_p0 = scmp.ne.s32.totalorder %s18_s13, %s242_s16  ;;  %p248_p2 = scmp.lt.s32.totalorder %s242_s16, %s242_s16 }
   0x7   :  { %p249_p3 = por %p248_p2, %p247_p1 }
   0x9   :  { %p250_p4 = pnand %p249_p3, %p243_p0 }
   0xb   :  { %253 = shalt.err (!%p250_p4)
}
   0xc   :  { %20 = dma.hbm_to_vmem [thread:$0]  %s339_s0, 128, %s18_s13, [#allocation4]  }
   0xd   :  { %s262_s19 = scalar_lea.vmem %s27_s15, 2048  ;;  %p267_p6 = scmp.lt.s32.totalorder %s27_s15, %s27_s15 }
   0xe   :  { %p263_p5 = scmp.ne.s32.totalorder %s27_s15, %s262_s19  ;;  %p268_p7 = scmp.lt.s32.totalorder %s262_s19, %s262_s19 }
  0x10   :  { %p269_p8 = por %p268_p7, %p267_p6 }
  0x12   :  { %p270_p9 = pnand %p269_p8, %p263_p5 }
  0x14   :  { %273 = shalt.err (!%p270_p9)
}
  0x15   :  { %s302_s20 = smov 128   ;;  %s303_s21 = smov 8  }
  0x16   :  { %32 = dma.hbm_to_vmem [thread:$0]  %s340_s1, 2048, %s27_s15, [#allocation7], %s302_s20, %s302_s20, %s303_s21  }
  0x17   :  { %294 = dma.done.wait [#allocation4], 128  }
  0x18   :  { %295 = vsyncadd [#allocation4], 4294967168 }
  0x19   :  { %296 = dma.done.wait [#allocation7], 2048  }
  0x1a   :  { %297 = vsyncadd [#allocation7], 4294965248  ;;  %v304_v0 = vmov 0.0   ;;  %vm305_vm0 = vmmov 0   ;;  %v63_v1 = vld [vmem:[#allocation6 + $0x78] sm:$0xff]  ;;  %v62_v2 = vld [vmem:[#allocation6 + $0x70] sm:$0xff] }
  0x1b   :  { %188 = vmatprep.subr.mxu0 %v304_v0  ;;  %220 = vmatprep.mubr.msk.f32.mxu0 %vm305_vm0, %v304_v0  ;;  %v61_v3 = vld [vmem:[#allocation6 + $0x68] sm:$0xff]  ;;  %v60_v4 = vld [vmem:[#allocation6 + $0x60] sm:$0xff]  ;;  %v59_v5 = vld [vmem:[#allocation6 + $0x58] sm:$0xff]  ;;  %s306_s24 = smov [#allocation8]  }
  0x1c   :  { %189 = vmatpush3.msra.mxu0 %v63_v1  ;;  %v58_v6 = vld [vmem:[#allocation6 + $0x50] sm:$0xff]  ;;  %v57_v7 = vld [vmem:[#allocation6 + $0x48] sm:$0xff]  ;;  %v56_v8 = vld [vmem:[#allocation6 + $0x40] sm:$0xff]  ;;  %s160_s25 = sshll.u32 %s306_s24, 4  ;;  %s161_s25 = int_to_ptr.vmem [resolvable:$true] %s160_s25 }
  0x1d   :  { %190 = vmatprep.subr.mxu0 %v304_v0  ;;  %v55_v9 = vld [vmem:[#allocation6 + $0x38] sm:$0xff]  ;;  %v54_v10 = vld [vmem:[#allocation6 + $0x30] sm:$0xff]  ;;  %v53_v11 = vld [vmem:[#allocation6 + $0x28] sm:$0xff]  ;;  %s274_s26 = scalar_lea.vmem %s161_s25, 128  ;;  %p279_p11 = scmp.lt.s32.totalorder %s161_s25, %s161_s25 }
  0x1e   :  { %191 = vmatpush3.msra.mxu0 %v62_v2  ;;  %v52_v12 = vld [vmem:[#allocation6 + $0x20] sm:$0xff]  ;;  %v51_v13 = vld [vmem:[#allocation6 + $0x18] sm:$0xff]  ;;  %v50_v14 = vld [vmem:[#allocation6 + $0x10] sm:$0xff]  ;;  %p275_p10 = scmp.ne.s32.totalorder %s161_s25, %s274_s26  ;;  %p280_p12 = scmp.lt.s32.totalorder %s274_s26, %s274_s26 }
  0x1f   :  { %192 = vmatprep.subr.mxu0 %v304_v0  ;;  %v49_v15 = vld [vmem:[#allocation6 + $0x8] sm:$0xff]  ;;  %v48_v16 = vld [vmem:[#allocation6] sm:$0xff]  ;;  %v47_v17 = vld [vmem:[#allocation3] sm:$0xff] }
  0x20   :  { %193 = vmatpush3.msra.mxu0 %v61_v3  ;;  %v170_v18 = vld [vmem:[%s341_s2] ss:$0 sm:$0xff]  ;;  %p281_p13 = por %p280_p12, %p279_p11 }
  0x21   :  { %194 = vmatprep.subr.mxu0 %v304_v0 }
  0x22   :  { %195 = vmatpush3.msra.mxu0 %v60_v4  ;;  %p282_p0 = pnand %p281_p13, %p275_p10 }
  0x23   :  { %196 = vmatprep.subr.mxu0 %v304_v0 }
  0x24   :  { %197 = vmatpush3.msra.mxu0 %v59_v5 }
  0x25   :  { %198 = vmatprep.subr.mxu0 %v304_v0 }
  0x26   :  { %199 = vmatpush3.msra.mxu0 %v58_v6 }
  0x27   :  { %200 = vmatprep.subr.mxu0 %v304_v0 }
  0x28   :  { %201 = vmatpush3.msra.mxu0 %v57_v7 }
  0x29   :  { %202 = vmatprep.subr.mxu0 %v304_v0 }
  0x2a   :  { %203 = vmatpush3.msra.mxu0 %v56_v8 }
  0x2b   :  { %204 = vmatprep.subr.mxu0 %v304_v0 }
  0x2c   :  { %205 = vmatpush3.msra.mxu0 %v55_v9 }
  0x2d   :  { %206 = vmatprep.subr.mxu0 %v304_v0 }
  0x2e   :  { %207 = vmatpush3.msra.mxu0 %v54_v10 }
  0x2f   :  { %208 = vmatprep.subr.mxu0 %v304_v0 }
  0x30   :  { %209 = vmatpush3.msra.mxu0 %v53_v11 }
  0x31   :  { %210 = vmatprep.subr.mxu0 %v304_v0 }
  0x32   :  { %211 = vmatpush3.msra.mxu0 %v52_v12 }
  0x33   :  { %212 = vmatprep.subr.mxu0 %v304_v0 }
  0x34   :  { %213 = vmatpush3.msra.mxu0 %v51_v13 }
  0x35   :  { %214 = vmatprep.subr.mxu0 %v304_v0 }
  0x36   :  { %215 = vmatpush3.msra.mxu0 %v50_v14 }
  0x37   :  { %216 = vmatprep.subr.mxu0 %v304_v0 }
  0x38   :  { %217 = vmatpush3.msra.mxu0 %v49_v15 }
  0x39   :  { %218 = vmatprep.subr.mxu0 %v304_v0 }
  0x3a   :  { %219 = vmatpush3.msra.mxu0 %v48_v16 }
  0x3b   :  { %221 = vmatmul.mubr.f32.vlgmr.msra.gmra.mxu0 %v47_v17 }
  0xfb   :  { %v130_v19 = vpop.f32.mrf.mxu0 }
  0xfc   :  { %v147_v20 = vadd.f32 %v170_v18, %v130_v19 }
  0xfd   :  { %v222_v21 = vpop.f32.mrf.mxu0 }
  0xfe   :  { %v148_v22 = vsub.f32 0.0, %v147_v20 }
 0x100   :  { %v149_v23 = vmul.f32 1.442695, %v148_v22 }
 0x102   :  { %230 = vpow2.f32 %v149_v23 }
 0x10f   :  { %v231_v24 = vpop.eup %230 }
 0x110   :  { %v151_v25 = vadd.f32 1.0, %v231_v24 }
 0x112   :  { %232 = vrcp.f32 %v151_v25 }
 0x11f   :  { %v233_v26 = vpop.eup %232 }
 0x120   :  { %153 = vst [vmem:[#allocation8] sm:$0xff] %v233_v26 }
 0x121   :  { %285 = shalt.err (!%p282_p0)
}
 0x122   :  { %163 = dma.vmem_to_hbm [thread:$0]  %s161_s25, 128, %s342_s3, [#allocation5]  }
 0x123   :  { %298 = dma.done.wait [#allocation5], 128  }
 0x124   :  { %299 = vsyncadd [#allocation5], 4294967168 }
 0x125   :  { %167 = vsyncpa [#allocation4], 1 }
 0x126   :  { %168 = vsyncpa [#allocation7], 1 }
 0x127   :  { %169 = vsyncpa [#allocation5], 1 }

</bundles_post_ra>
